<compile_context>
chip_gen: v5e
topology: v5e:2x2
jax: 0.10.0
libtpu: 0.0.40
codegen_flags: <defaults>
</compile_context>

<pallas_src>
import functools

import jax
import jax.numpy as jnp
from jax import lax
from jax.experimental import pallas as pl
from jax.experimental.pallas import tpu as pltpu


def _round_up(x, m):
    return ((x + m - 1) // m) * m


def _choose_tm(n, c, itemsize, budget_bytes=24 << 20, cap=32768):
    """Pick the row-tile so double-buffered (logits + lane-padded labels) fits VMEM."""
    c_lanes = _round_up(c, 128)
    per_row = 2 * c_lanes * itemsize   # logits block, double-buffered
    per_row += 2 * 128 * 4             # (tm,1) int32 labels lane-pad to 128, double-buffered
    tm = budget_bytes // per_row
    tm = min(int(tm), cap, _round_up(n, 32))
    tm = max(32, (tm // 32) * 32)      # multiple of 32: covers f32/bf16/int8 sublane tiling
    return int(tm)


def _alpha_fairness_kernel(logits_ref, labels_ref, out_ref, acc_ref, *,
                           n_samples, tm, tiles_per_core, need_mask):
    p = pl.program_id(0)               # core-split axis ("parallel")
    i = pl.program_id(1)               # reduction axis ("arbitrary")
    n_inner = pl.num_programs(1)

    @pl.when(i == 0)
    def _init():
        acc_ref[...] = jnp.zeros_like(acc_ref)

    logits = logits_ref[...].astype(jnp.float32)      # (TM, C) f32 (upcast in-kernel)
    labels = labels_ref[...]                          # (TM, 1) i32
    TM, C = logits.shape
    class_ids = lax.broadcasted_iota(jnp.int32, (TM, C), 1)

    if need_mask:
        # Partial / phantom tiles: zero pad-row logits (keeps LSE finite, no
        # NaN*0 into the MXU) and exclude pad rows from the onehot.
        tile_idx = p * tiles_per_core + i
        row_ids = lax.broadcasted_iota(jnp.int32, (TM, 1), 0) + tile_idx * tm
        valid = row_ids < n_samples                               # (TM, 1) bool
        logits = jnp.where(valid, logits, 0.0)
        onehot = jnp.logical_and(labels == class_ids, valid).astype(jnp.float32)
    else:
        onehot = (labels == class_ids).astype(jnp.float32)        # (TM, C)

    # --- per-sample cross entropy (log-sum-exp over the class/lane axis) ---
    m = jnp.max(logits, axis=-1, keepdims=True)                               # (TM, 1)
    lse = m + jnp.log(jnp.sum(jnp.exp(logits - m), axis=-1, keepdims=True))   # (TM, 1)
    picked = jnp.sum(onehot * logits, axis=-1, keepdims=True)                 # (TM, 1)
    ce = lse - picked                                                         # (TM, 1)

    # --- fused per-class [ce_sums ; counts] via one MXU contraction over TM ---
    lhs = jnp.concatenate([ce, jnp.ones_like(ce)], axis=1)                    # (TM, 2)
    partial = lax.dot_general(
        lhs, onehot,
        dimension_numbers=(((0,), (0,)), ((), ())),
        preferred_element_type=jnp.float32)                                   # (2, C)
    acc_ref[...] += partial

    @pl.when(i == n_inner - 1)
    def _store():
        out_ref[0] = acc_ref[...]


def alpha_fairness_loss(outputs, labels, alpha=2.0, tm=None):
    """outputs: (N, C) float logits (f32 or bf16), labels: (N,) int.

    Returns a scalar f32 loss matching AlphaFairnessLoss.forward with
    client_labels=None.
    """
    N, C = outputs.shape
    labels2d = labels.reshape(N, 1).astype(jnp.int32)

    if tm is None:
        tm = _choose_tm(N, C, jnp.dtype(outputs.dtype).itemsize)
    else:
        tm = int(min(int(tm), _round_up(N, 32)))
        tm = max(32, (tm // 32) * 32)

    total_tiles = pl.cdiv(N, tm)
    num_cores = 2 if total_tiles >= 2 else 1          # v7x: 2 TCs; harmless elsewhere
    tiles_per_core = pl.cdiv(total_tiles, num_cores)
    coverage = num_cores * tiles_per_core * tm
    need_mask = coverage != N                         # static: skip mask work on full grids
    has_phantom = num_cores * tiles_per_core > total_tiles

    def tile_map(p, i):
        t = p * tiles_per_core + i
        if has_phantom:
            t = jnp.minimum(t, total_tiles - 1)       # clamp phantom blocks; masked in-kernel
        return (t, 0)

    kernel = functools.partial(
        _alpha_fairness_kernel, n_samples=N, tm=tm,
        tiles_per_core=tiles_per_core, need_mask=need_mask)

    acc = pl.pallas_call(
        kernel,
        out_shape=jax.ShapeDtypeStruct((num_cores, 2, C), jnp.float32),
        grid_spec=pltpu.PrefetchScalarGridSpec(
            num_scalar_prefetch=0,
            grid=(num_cores, tiles_per_core),
            in_specs=[
                pl.BlockSpec((tm, C), tile_map),      # logits tile (native dtype)
                pl.BlockSpec((tm, 1), tile_map),      # labels tile
            ],
            out_specs=pl.BlockSpec((1, 2, C), lambda p, i: (p, 0, 0)),
            scratch_shapes=[pltpu.VMEM((2, C), jnp.float32)],  # [ce_sums; counts]
        ),
        compiler_params=pltpu.CompilerParams(
            dimension_semantics=("parallel", "arbitrary"),
            vmem_limit_bytes=32 * 1024 * 1024,        # safe on v7x (64 MiB phys), v5e/v6e
        ),
    )(outputs, labels2d)

    # --- tiny nonlinear finalize in plain JAX (num_cores*2*C elements) ---
    acc = jnp.sum(acc, axis=0)                        # (2, C)
    ce_sum = acc[0]
    cnt = acc[1]
    present = cnt > 0.0
    safe = jnp.where(present, ce_sum, 1.0)
    if float(alpha) == int(alpha):
        powed = lax.integer_pow(safe, int(alpha))     # VPU multiplies
    else:
        powed = safe ** jnp.float32(alpha)
    return jnp.sum(jnp.where(present, powed, 0.0)) / jnp.float32(N)


def _reference_loss(outputs, labels, alpha=2.0):
    """Pure-JAX reference mirroring the PyTorch forward (client_labels=None)."""
    logits = outputs.astype(jnp.float32)
    lse = jax.nn.logsumexp(logits, axis=-1)
    picked = jnp.take_along_axis(
        logits, labels[:, None].astype(jnp.int32), axis=-1)[:, 0]
    ce = lse - picked
    loss = 0.0
    for lab in jnp.unique(labels):
        mask = labels == lab
        s = jnp.sum(jnp.where(mask, ce, 0.0))
        loss = loss + s ** alpha
    return loss / outputs.shape[0]


if __name__ == "__main__":
    key = jax.random.PRNGKey(0)

    # Case 1: small single-tile grid, exact coverage (mask-free fast path).
    k1, k2 = jax.random.split(key)
    N1, C1 = 64, 10
    outputs1 = jax.random.normal(k1, (N1, C1), dtype=jnp.float32)
    labels1 = jax.random.randint(k2, (N1,), 0, C1, dtype=jnp.int32)

    loss1 = jax.block_until_ready(alpha_fairness_loss(outputs1, labels1, alpha=2.0))
    ref1 = _reference_loss(outputs1, labels1, alpha=2.0)
    assert jnp.allclose(loss1, ref1, rtol=1e-3, atol=1e-4), (loss1, ref1)

    # Non-integer alpha exercises the float-pow finalize path (plain JAX).
    loss1b = jax.block_until_ready(alpha_fairness_loss(outputs1, labels1, alpha=2.5))
    ref1b = _reference_loss(outputs1, labels1, alpha=2.5)
    assert jnp.allclose(loss1b, ref1b, rtol=1e-3, atol=1e-4), (loss1b, ref1b)

    # Case 2: two-core split with partial last tile + phantom tile
    # (exercises row masking and clamped index_map).
    k3, k4 = jax.random.split(k1)
    N2, C2 = 200, 10
    outputs2 = jax.random.normal(k3, (N2, C2), dtype=jnp.float32)
    labels2 = jax.random.randint(k4, (N2,), 0, C2, dtype=jnp.int32)

    loss2 = jax.block_until_ready(
        alpha_fairness_loss(outputs2, labels2, alpha=2.0, tm=32))
    ref2 = _reference_loss(outputs2, labels2, alpha=2.0)
    assert jnp.allclose(loss2, ref2, rtol=1e-3, atol=1e-3), (loss2, ref2)

    # Case 3: two-core split with exact coverage (multi-tile, mask-free path).
    k5, k6 = jax.random.split(k3)
    N3, C3 = 256, 10
    outputs3 = jax.random.normal(k5, (N3, C3), dtype=jnp.float32)
    labels3 = jax.random.randint(k6, (N3,), 0, C3, dtype=jnp.int32)

    loss3 = jax.block_until_ready(
        alpha_fairness_loss(outputs3, labels3, alpha=2.0, tm=64))
    ref3 = _reference_loss(outputs3, labels3, alpha=2.0)
    assert jnp.allclose(loss3, ref3, rtol=1e-3, atol=1e-3), (loss3, ref3)

    print("KERNEL_OK")
</pallas_src>

<mosaic_0001>
module attributes {stable_mosaic.version = 11 : i64} {
  func.func @_alpha_fairness_kernel(%arg0: i32, %arg1: i32, %arg2: memref<64x10xf32, #tpu.memory_space<vmem>>, %arg3: memref<64x1xi32, #tpu.memory_space<vmem>>, %arg4: memref<1x2x10xf32, #tpu.memory_space<vmem>>, %arg5: memref<2x10xf32, #tpu.memory_space<vmem>>) attributes {dimension_semantics = [#tpu.dimension_semantics<parallel>, #tpu.dimension_semantics<arbitrary>], iteration_bounds = array<i64: 1, 1>, scalar_prefetch = 0 : i64, scratch_operands = 1 : i64, tpu.core_type = #tpu.core_type<tc>, window_params = [{transform_indices = @transform_0, window_bounds = array<i64: 64, 10>}, {transform_indices = @transform_1, window_bounds = array<i64: 64, 1>}, {transform_indices = @transform_2, window_bounds = array<i64: 1, 2, 10>}]} {
    %c0_i32 = arith.constant 0 : i32
    %0 = arith.cmpi eq, %arg1, %c0_i32 : i32
    %1 = arith.extui %0 : i1 to i32
    %c0_i32_0 = arith.constant 0 : i32
    %2 = arith.cmpi ne, %1, %c0_i32_0 : i32
    scf.if %2 {
      %cst_14 = arith.constant 0.000000e+00 : f32
      %32 = vector.broadcast %cst_14 : f32 to vector<2x10xf32>
      %c0_15 = arith.constant 0 : index
      %c0_16 = arith.constant 0 : index
      %33 = vector.load %arg5[%c0_15, %c0_16] : memref<2x10xf32, #tpu.memory_space<vmem>>, vector<2x10xf32>
      tpu.vector_store %arg5[%c0_15, %c0_16], %32 {strides = array<i32>} : memref<2x10xf32, #tpu.memory_space<vmem>>, vector<2x10xf32>,
    } else {
    }
    %c0 = arith.constant 0 : index
    %c0_1 = arith.constant 0 : index
    %3 = vector.load %arg2[%c0, %c0_1] : memref<64x10xf32, #tpu.memory_space<vmem>>, vector<64x10xf32>
    %c0_2 = arith.constant 0 : index
    %c0_3 = arith.constant 0 : index
    %4 = vector.load %arg3[%c0_2, %c0_3] : memref<64x1xi32, #tpu.memory_space<vmem>>, vector<64x1xi32>
    %5 = tpu.iota {dimensions = array<i32: 1>} : vector<64x10xi32>
    %6 = vector.broadcast %4 : vector<64x1xi32> to vector<64x10xi32>
    %7 = arith.cmpi eq, %6, %5 : vector<64x10xi32>
    %8 = arith.extui %7 : vector<64x10xi1> to vector<64x10xi32>
    %9 = arith.sitofp %8 : vector<64x10xi32> to vector<64x10xf32>
    %cst = arith.constant dense<0xFF800000> : vector<64xf32>
    %10 = vector.multi_reduction <maximumf>, %3, %cst [1] : vector<64x10xf32> to vector<64xf32>
    %11 = vector.shape_cast %10 : vector<64xf32> to vector<64x1xf32>
    %12 = vector.broadcast %11 : vector<64x1xf32> to vector<64x10xf32>
    %13 = arith.subf %3, %12 : vector<64x10xf32>
    %14 = math.exp %13 : vector<64x10xf32>
    %cst_4 = arith.constant dense<0.000000e+00> : vector<64xf32>
    %15 = vector.multi_reduction <add>, %14, %cst_4 [1] : vector<64x10xf32> to vector<64xf32>
    %16 = vector.shape_cast %15 : vector<64xf32> to vector<64x1xf32>
    %17 = math.log %16 : vector<64x1xf32>
    %18 = arith.addf %11, %17 : vector<64x1xf32>
    %19 = arith.mulf %9, %3 : vector<64x10xf32>
    %cst_5 = arith.constant dense<0.000000e+00> : vector<64xf32>
    %20 = vector.multi_reduction <add>, %19, %cst_5 [1] : vector<64x10xf32> to vector<64xf32>
    %21 = vector.shape_cast %20 : vector<64xf32> to vector<64x1xf32>
    %22 = arith.subf %18, %21 : vector<64x1xf32>
    %cst_6 = arith.constant 1.000000e+00 : f32
    %23 = vector.broadcast %cst_6 : f32 to vector<64x1xf32>
    %24 = tpu.concatenate %22, %23 in 1 : vector<64x1xf32>, vector<64x1xf32> -> vector<64x2xf32>
    %cst_7 = arith.constant dense<0.000000e+00> : vector<2x10xf32>
    %25 = tpu.matmul %24, %9, %cst_7 {dimension_numbers = #tpu.dot_dimension_numbers<[0], [0], [1], [1], [0, 1, 1, 1], [], []>} : vector<64x2xf32>, vector<64x10xf32>, vector<2x10xf32> -> vector<2x10xf32>
    %c0_8 = arith.constant 0 : index
    %c0_9 = arith.constant 0 : index
    %26 = vector.load %arg5[%c0_8, %c0_9] : memref<2x10xf32, #tpu.memory_space<vmem>>, vector<2x10xf32>
    %27 = arith.addf %26, %25 : vector<2x10xf32>
    %c0_10 = arith.constant 0 : index
    %c0_11 = arith.constant 0 : index
    %28 = vector.load %arg5[%c0_10, %c0_11] : memref<2x10xf32, #tpu.memory_space<vmem>>, vector<2x10xf32>
    tpu.vector_store %arg5[%c0_10, %c0_11], %27 {strides = array<i32>} : memref<2x10xf32, #tpu.memory_space<vmem>>, vector<2x10xf32>,
    %c0_i32_12 = arith.constant 0 : i32
    %29 = arith.cmpi eq, %arg1, %c0_i32_12 : i32
    %30 = arith.extui %29 : i1 to i32
    %c0_i32_13 = arith.constant 0 : i32
    %31 = arith.cmpi ne, %30, %c0_i32_13 : i32
    scf.if %31 {
      %c0_14 = arith.constant 0 : index
      %c0_15 = arith.constant 0 : index
      %32 = vector.load %arg5[%c0_14, %c0_15] : memref<2x10xf32, #tpu.memory_space<vmem>>, vector<2x10xf32>
      %c0_16 = arith.constant 0 : index
      %c0_17 = arith.constant 0 : index
      %c0_18 = arith.constant 0 : index
      %33 = vector.load %arg4[%c0_16, %c0_17, %c0_18] : memref<1x2x10xf32, #tpu.memory_space<vmem>>, vector<1x2x10xf32>
      %34 = vector.shape_cast %33 : vector<1x2x10xf32> to vector<2x10xf32>
      %35 = vector.shape_cast %32 : vector<2x10xf32> to vector<1x2x10xf32>
      tpu.vector_store %arg4[%c0_16, %c0_17, %c0_18], %35 {strides = array<i32>} : memref<1x2x10xf32, #tpu.memory_space<vmem>>, vector<1x2x10xf32>,
    } else {
    }
    return
  }
  func.func @transform_0(%arg0: i32, %arg1: i32) -> (i32, i32) {
    %c1_i32 = arith.constant 1 : i32
    %0 = arith.muli %arg0, %c1_i32 : i32
    %1 = arith.addi %0, %arg1 : i32
    %c0_i32 = arith.constant 0 : i32
    %c0_i32_0 = arith.constant 0 : i32
    return %1, %c0_i32 : i32, i32
  }
  func.func @transform_1(%arg0: i32, %arg1: i32) -> (i32, i32) {
    %c1_i32 = arith.constant 1 : i32
    %0 = arith.muli %arg0, %c1_i32 : i32
    %1 = arith.addi %0, %arg1 : i32
    %c0_i32 = arith.constant 0 : i32
    %c0_i32_0 = arith.constant 0 : i32
    return %1, %c0_i32 : i32, i32
  }
  func.func @transform_2(%arg0: i32, %arg1: i32) -> (i32, i32, i32) {
    %c0_i32 = arith.constant 0 : i32
    %c0_i32_0 = arith.constant 0 : i32
    %c0_i32_1 = arith.constant 0 : i32
    return %arg0, %c0_i32, %c0_i32_0 : i32, i32, i32
  }
}

</mosaic_0001>

<bundles_post_ra>
// kernel: tpu_custom_call.1
= control target key start
LH: loop header
LB: loop body
LE: loop exit
PB: predicated region body
PF: predicated region fallthrough
CT: control target
= control target key end

     0   :  { %vm128_vm0 = vcmask 80896   ;;  %v449_v6 = vmov 0   ;;  %s684_s0 = inlined_call_operand.vmem [shape: f32[64,10], index: 0, kind: input, shape index: {}]   ;;  %s685_s1 = inlined_call_operand.vmem [shape: s32[64,1], index: 1, kind: input, shape index: {}]   ;;  %s686_s2 = inlined_call_operand.hbm [shape: f32[1,2,10], index: 2, kind: output, shape index: {}]  }
   0x1   :  { %v471_v0 = vld [vmem:[%s684_s0 + $0x20] sm:$0xff]  ;;  %v476_v1 = vld [vmem:[%s684_s0 + $0x10] sm:$0xff]  ;;  %388 = vset.pattern.permute.xlu1 %v449_v6  ;;  %389 = vset.pattern.permute.xlu0 %v449_v6 }
   0x2   :  { %v481_v2 = vld [vmem:[%s684_s0] sm:$0xff]  ;;  %v141_v3 = vsel %vm128_vm0, %v471_v0, -inf  ;;  %v135_v4 = vsel %vm128_vm0, %v476_v1, -inf  ;;  %390 = vset.pattern.permute.xlu2 %v449_v6 }
   0x3   :  { %v129_v5 = vsel %vm128_vm0, %v481_v2, -inf  ;;  %142 = vmax.xlane.f32.xlu2 %v141_v3  ;;  %136 = vmax.xlane.f32.xlu1 %v135_v4 }
   0x4   :  { %130 = vmax.xlane.f32.xlu0 %v129_v5 }
   0x5   :  { %7 = vsyncpa [#allocation4], 0  ;;  %v492_v7 = vld [vmem:[%s684_s0 + $0x28] sm:$0xff]  ;;  %v497_v8 = vld [vmem:[%s684_s0 + $0x18] sm:$0xff]  ;;  %v78_v37 = vlaneseq  ;;  %v450_v45 = vmov 0.0   ;;  %vm265_vm9 = vcmask 7168  }
   0x6   :  { %v502_v9 = vld [vmem:[%s684_s0 + $0x8] sm:$0xff]  ;;  %v144_v10 = vsel %vm128_vm0, %v492_v7, -inf  ;;  %v138_v11 = vsel %vm128_vm0, %v497_v8, -inf  ;;  %v513_v13 = vld [vmem:[%s684_s0 + $0x38] sm:$0xff]  ;;  %v518_v14 = vld [vmem:[%s684_s0 + $0x30] sm:$0xff]  ;;  %vm60_vm10 = vcmask 74752  }
   0x7   :  { %v132_v12 = vsel %vm128_vm0, %v502_v9, -inf  ;;  %v150_v15 = vsel %vm128_vm0, %v513_v13, -inf  ;;  %v147_v16 = vsel %vm128_vm0, %v518_v14, -inf  ;;  %v70_v17 = vld [vmem:[%s685_s1] sm:$0xff]  ;;  %v71_v18 = vld [vmem:[%s685_s1 + $0x8] sm:$0xff]  ;;  %v72_v19 = vld [vmem:[%s685_s1 + $0x10] sm:$0xff] }
   0x8   :  { %v73_v20 = vld [vmem:[%s685_s1 + $0x18] sm:$0xff]  ;;  %v74_v21 = vld [vmem:[%s685_s1 + $0x20] sm:$0xff]  ;;  %v75_v22 = vld [vmem:[%s685_s1 + $0x28] sm:$0xff]  ;;  %v568_v41 = vand.u32 127, %v78_v37  ;;  %61 = vst.msk [vmem:[#allocation2] sm:$0x3] %vm60_vm10, %v450_v45 }
   0x9   :  { %v76_v23 = vld [vmem:[%s685_s1 + $0x30] sm:$0xff]  ;;  %v77_v24 = vld [vmem:[%s685_s1 + $0x38] sm:$0xff]  ;;  %vm306_vm11 = vcmask 523264   ;;  %s452_s1 = smov [#allocation3]   ;;  %s346_s15 = sshll.u32 %s686_s2, 4  ;;  %s347_s15 = int_to_ptr.hbm [resolvable:$true] %s346_s15 }
   0xa   :  { %s344_s12 = sshll.u32 %s452_s1, 4  ;;  %s345_s12 = int_to_ptr.vmem [resolvable:$true] %s344_s12 }
   0xb   :  { %145 = vmax.xlane.f32.xlu2 %v144_v10  ;;  %139 = vmax.xlane.f32.xlu1 %v138_v11 }
   0xc   :  { %133 = vmax.xlane.f32.xlu0 %v132_v12 }
  0x13   :  { %151 = vmax.xlane.f32.xlu2 %v150_v15 }
  0x14   :  { %148 = vmax.xlane.f32.xlu0 %v147_v16 }
  0x24   :  { %81 = vperm.xlu1 %388, %v70_v17  }
  0x28   :  { %84 = vperm.xlu0 %389, %v71_v18  }
  0x2b   :  { %87 = vperm.xlu2 %390, %v72_v19  }
  0x2c   :  { %90 = vperm.xlu1 %388, %v73_v20  }
  0x33   :  { %93 = vperm.xlu2 %390, %v74_v21  }
  0x34   :  { %96 = vperm.xlu1 %388, %v75_v22  }
  0x3b   :  { %99 = vperm.xlu2 %390, %v76_v23  }
  0x3c   :  { %102 = vperm.xlu1 %388, %v77_v24  }
  0x76   :  { %v548_v25 = vpop.xlane.xlu2 %142  ;;  %v550_v26 = vpop.xlane.xlu1 %136 }
  0x77   :  { %v155_v27 = vsub.f32 %v476_v1, %v550_v26  ;;  %v157_v28 = vsub.f32 %v471_v0, %v548_v25  ;;  %v556_v31 = vpop.xlane.xlu0 %130 }
  0x78   :  { %v153_v48 = vsub.f32 %v481_v2, %v556_v31 }
  0x79   :  { %v165_v29 = vmul.f32 1.442695, %v155_v27  ;;  %v169_v30 = vmul.f32 1.442695, %v157_v28 }
  0x7a   :  { %v161_v52 = vmul.f32 1.442695, %v153_v48 }
  0x7b   :  { %391 = vpow2.f32 %v165_v29 }
  0x7c   :  { %393 = vpow2.f32 %v169_v30 }
  0x7e   :  { %v558_v32 = vpop.xlane.xlu2 %145  ;;  %v570_v43 = vpop.xlane.xlu1 %139 }
  0x7f   :  { %v563_v38 = vpop.xlane.xlu0 %133  ;;  %v158_v6 = vsub.f32 %v492_v7, %v558_v32 }
  0x80   :  { %v154_v53 = vsub.f32 %v502_v9, %v563_v38 }
  0x81   :  { %v392_v33 = vpop.eup %391  ;;  %v171_v17 = vmul.f32 1.442695, %v158_v6 }
  0x82   :  { %v183_v34 = vsel %vm128_vm0, %v392_v33, 0.0  ;;  %v394_v35 = vpop.eup %393  ;;  %v163_v59 = vmul.f32 1.442695, %v154_v53 }
  0x83   :  { %184 = vadd.xlane.f32.xlu1 %v183_v34  ;;  %v189_v40 = vsel %vm128_vm0, %v394_v35, 0.0 }
  0x86   :  { %v561_v36 = vpop.xlane.xlu2 %151 }
  0x87   :  { %v160_v39 = vsub.f32 %v513_v13, %v561_v36  ;;  %v583_v49 = vpop.xlane.xlu0 %148 }
  0x88   :  { %v159_v19 = vsub.f32 %v518_v14, %v583_v49 }
  0x89   :  { %v175_v42 = vmul.f32 1.442695, %v160_v39 }
  0x8a   :  { %v173_v23 = vmul.f32 1.442695, %v159_v19 }
  0x8b   :  { %190 = vadd.xlane.f32.xlu1 %v189_v40  ;;  %395 = vpow2.f32 %v175_v42 }
  0x8c   :  { %397 = vpow2.f32 %v161_v52 }
  0x8d   :  { %399 = vpow2.f32 %v163_v59 }
  0x8e   :  { %v572_v44 = vpop.permute.xlu2 %87 }
  0x8f   :  { %vm106_vm1 = vcmp.eq.s32.totalorder %v572_v44, %v568_v41 }
  0x90   :  { %v369_v46 = vsel %vm106_vm1, 1.0, %v450_v45 }
  0x91   :  { %v227_v47 = vmul.f32 %v369_v46, %v476_v1  ;;  %v396_v51 = vpop.eup %395  ;;  %v156_v1 = vsub.f32 %v497_v8, %v570_v43 }
  0x92   :  { %v198_v57 = vsel %vm128_vm0, %v396_v51, 0.0  ;;  %v398_v5 = vpop.eup %397 }
  0x93   :  { %v239_v50 = vsel %vm128_vm0, %v227_v47, 0.0  ;;  %v167_v11 = vmul.f32 1.442695, %v156_v1  ;;  %v177_v12 = vsel %vm128_vm0, %v398_v5, 0.0  ;;  %v400_v16 = vpop.eup %399 }
  0x94   :  { %240 = vadd.xlane.f32.xlu1 %v239_v50  ;;  %v180_v21 = vsel %vm128_vm0, %v400_v16, 0.0 }
  0x95   :  { %401 = vpow2.f32 %v167_v11 }
  0x96   :  { %v588_v54 = vpop.permute.xlu1 %81  ;;  %v590_v55 = vpop.permute.xlu2 %93  ;;  %403 = vpow2.f32 %v171_v17 }
  0x97   :  { %vm104_vm2 = vcmp.eq.s32.totalorder %v588_v54, %v568_v41  ;;  %405 = vpow2.f32 %v173_v23  ;;  %vm108_vm8 = vcmp.eq.s32.totalorder %v590_v55, %v568_v41 }
  0x98   :  { %v367_v56 = vsel %vm104_vm2, 1.0, %v450_v45  ;;  %v371_v35 = vsel %vm108_vm8, 1.0, %v450_v45 }
  0x99   :  { %v225_v58 = vmul.f32 %v367_v56, %v481_v2  ;;  %v229_v40 = vmul.f32 %v371_v35, %v471_v0 }
  0x9a   :  { %v600_v60 = vpop.permute.xlu0 %84 }
  0x9b   :  { %vm105_vm3 = vcmp.eq.s32.totalorder %v600_v60, %v568_v41  ;;  %v233_v61 = vsel %vm128_vm0, %v225_v58, 0.0  ;;  %v402_v27 = vpop.eup %401  ;;  %v245_v46 = vsel %vm128_vm0, %v229_v40, 0.0 }
  0x9c   :  { %v368_v62 = vsel %vm105_vm3, 1.0, %v450_v45  ;;  %199 = vadd.xlane.f32.xlu1 %v198_v57  ;;  %234 = vadd.xlane.f32.xlu0 %v233_v61  ;;  %v404_v28 = vpop.eup %403  ;;  %v186_v30 = vsel %vm128_vm0, %v402_v27, 0.0 }
  0x9d   :  { %v226_v63 = vmul.f32 %v368_v62, %v502_v9  ;;  %v406_v33 = vpop.eup %405 }
  0x9e   :  { %v91_v2 = vpop.permute.xlu1 %90  ;;  %v100_v3 = vpop.permute.xlu2 %99  ;;  %v195_v37 = vsel %vm128_vm0, %v406_v33, 0.0 }
  0x9f   :  { %v236_v4 = vsel %vm128_vm0, %v226_v63, 0.0  ;;  %vm110_vm4 = vcmp.eq.s32.totalorder %v100_v3, %v568_v41  ;;  %vm107_vm5 = vcmp.eq.s32.totalorder %v91_v2, %v568_v41 }
  0xa0   :  { %237 = vadd.xlane.f32.xlu2 %v236_v4  ;;  %v373_v10 = vsel %vm110_vm4, 1.0, %v450_v45  ;;  %v370_v18 = vsel %vm107_vm5, 1.0, %v450_v45 }
  0xa1   :  { %v231_v9 = vmul.f32 %v373_v10, %v518_v14  ;;  %v228_v22 = vmul.f32 %v370_v18, %v497_v8  ;;  %v451_v14 = vmov 1.0   ;;  %v192_v8 = vsel %vm128_vm0, %v404_v28, 0.0 }
  0xa3   :  { %v251_v15 = vsel %vm128_vm0, %v231_v9, 0.0  ;;  %v242_v24 = vsel %vm128_vm0, %v228_v22, 0.0 }
  0xa4   :  { %178 = vadd.xlane.f32.xlu0 %v177_v12  ;;  %252 = vadd.xlane.f32.xlu1 %v251_v15 }
  0xa6   :  { %v97_v20 = vpop.permute.xlu1 %96 }
  0xa7   :  { %vm109_vm7 = vcmp.eq.s32.totalorder %v97_v20, %v568_v41 }
  0xa8   :  { %181 = vadd.xlane.f32.xlu2 %v180_v21  ;;  %v372_v34 = vsel %vm109_vm7, 1.0, %v450_v45 }
  0xa9   :  { %v230_v39 = vmul.f32 %v372_v34, %v492_v7 }
  0xab   :  { %v248_v42 = vsel %vm128_vm0, %v230_v39, 0.0 }
  0xac   :  { %243 = vadd.xlane.f32.xlu0 %v242_v24 }
  0xae   :  { %v103_v29 = vpop.permute.xlu1 %102 }
  0xaf   :  { %vm111_vm6 = vcmp.eq.s32.totalorder %v103_v29, %v568_v41 }
  0xb0   :  { %187 = vadd.xlane.f32.xlu2 %v186_v30  ;;  %375 = vmatpush.msk.msra.mxu0 %vm111_vm6, %v451_v14  ;;  %v374_v0 = vsel %vm111_vm6, 1.0, %v450_v45 }
  0xb1   :  { %v232_v7 = vmul.f32 %v374_v0, %v513_v13 }
  0xb2   :  { %376 = vmatpush.msk.msra.mxu0 %vm110_vm4, %v451_v14 }
  0xb3   :  { %v254_v44 = vsel %vm128_vm0, %v232_v7, 0.0 }
  0xb4   :  { %377 = vmatpush.msk.msra.mxu0 %vm109_vm7, %v451_v14  ;;  %193 = vadd.xlane.f32.xlu0 %v192_v8 }
  0xb6   :  { %378 = vmatpush.msk.msra.mxu0 %vm108_vm8, %v451_v14 }
  0xb8   :  { %196 = vadd.xlane.f32.xlu2 %v195_v37  ;;  %379 = vmatpush.msk.msra.mxu0 %vm107_vm5, %v451_v14 }
  0xba   :  { %380 = vmatpush.msk.msra.mxu0 %vm106_vm1, %v451_v14 }
  0xbc   :  { %381 = vmatpush.msk.msra.mxu0 %vm105_vm3, %v451_v14  ;;  %249 = vadd.xlane.f32.xlu0 %v248_v42  ;;  %v330_v42 = vld [vmem:[#allocation2] sm:$0x3] }
  0xbe   :  { %382 = vmatpush.msk.msra.mxu0 %vm104_vm2, %v451_v14 }
  0xc0   :  { %246 = vadd.xlane.f32.xlu2 %v245_v46 }
  0xc8   :  { %255 = vadd.xlane.f32.xlu2 %v254_v44 }
  0xf6   :  { %v185_v51 = vpop.xlane.xlu1 %184 }
  0xfe   :  { %v191_v58 = vpop.xlane.xlu1 %190 }
 0x107   :  { %v241_v3 = vpop.xlane.xlu1 %240 }
 0x10f   :  { %v235_v47 = vpop.xlane.xlu0 %234  ;;  %v200_v24 = vpop.xlane.xlu1 %199 }
 0x113   :  { %v238_v48 = vpop.xlane.xlu2 %237 }
 0x117   :  { %v179_v50 = vpop.xlane.xlu0 %178  ;;  %v253_v8 = vpop.xlane.xlu1 %252 }
 0x118   :  { %407 = vlog2.f32 %v179_v50 }
 0x11b   :  { %v182_v52 = vpop.xlane.xlu2 %181 }
 0x11c   :  { %409 = vlog2.f32 %v182_v52 }
 0x11d   :  { %411 = vlog2.f32 %v185_v51 }
 0x11e   :  { %v408_v53 = vpop.eup %407 }
 0x11f   :  { %v202_v54 = vmul.f32 0.6931472, %v408_v53  ;;  %v244_v1 = vpop.xlane.xlu0 %243 }
 0x121   :  { %v217_v55 = vadd.f32 %v202_v54, %v556_v31 }
 0x122   :  { %v410_v56 = vpop.eup %409 }
 0x123   :  { %v204_v41 = vmul.f32 0.6931472, %v410_v56  ;;  %v257_v57 = vsub.f32 %v217_v55, %v235_v47  ;;  %v188_v59 = vpop.xlane.xlu2 %187  ;;  %v412_v61 = vpop.eup %411 }
 0x124   :  { %413 = vlog2.f32 %v188_v59  ;;  %v206_v63 = vmul.f32 0.6931472, %v412_v61 }
 0x125   :  { %v218_v13 = vadd.f32 %v204_v41, %v563_v38  ;;  %v266_v60 = vsel %vm265_vm9, %v257_v57, 1.0  ;;  %415 = vlog2.f32 %v191_v58 }
 0x126   :  { %274 = vxpose.xlu0.b32.start [1/8] (short) (narrow) %v266_v60, 8  ;;  %v219_v4 = vadd.f32 %v206_v63, %v550_v26 }
 0x127   :  { %v258_v62 = vsub.f32 %v218_v13, %v238_v48  ;;  %v194_v11 = vpop.xlane.xlu0 %193 }
 0x128   :  { %v259_v5 = vsub.f32 %v219_v4, %v241_v3  ;;  %417 = vlog2.f32 %v194_v11 }
 0x129   :  { %v267_v2 = vsel %vm265_vm9, %v258_v62, 1.0 }
 0x12a   :  { %v414_v31 = vpop.eup %413  ;;  %v268_v10 = vsel %vm265_vm9, %v259_v5, 1.0 }
 0x12b   :  { %v208_v6 = vmul.f32 0.6931472, %v414_v31  ;;  %v197_v38 = vpop.xlane.xlu2 %196  ;;  %v416_v12 = vpop.eup %415 }
 0x12c   :  { %v210_v16 = vmul.f32 0.6931472, %v416_v12  ;;  %419 = vlog2.f32 %v197_v38 }
 0x12d   :  { %v220_v9 = vadd.f32 %v208_v6, %v570_v43  ;;  %421 = vlog2.f32 %v200_v24 }
 0x12e   :  { %275 = vxpose.xlu0.b32.cont [2/8] (short) (narrow) %v267_v2, 8  ;;  %v418_v18 = vpop.eup %417  ;;  %v221_v26 = vadd.f32 %v210_v16, %v548_v25 }
 0x12f   :  { %v260_v15 = vsub.f32 %v220_v9, %v244_v1  ;;  %v212_v20 = vmul.f32 0.6931472, %v418_v18  ;;  %v250_v27 = vpop.xlane.xlu0 %249 }
 0x131   :  { %v269_v17 = vsel %vm265_vm9, %v260_v15, 1.0  ;;  %v222_v22 = vadd.f32 %v212_v20, %v558_v32 }
 0x132   :  { %v420_v23 = vpop.eup %419 }
 0x133   :  { %v247_v19 = vpop.xlane.xlu2 %246  ;;  %v214_v28 = vmul.f32 0.6931472, %v420_v23  ;;  %v262_v29 = vsub.f32 %v222_v22, %v250_v27  ;;  %v422_v25 = vpop.eup %421 }
 0x134   :  { %v261_v21 = vsub.f32 %v221_v26, %v247_v19  ;;  %v216_v34 = vmul.f32 0.6931472, %v422_v25 }
 0x135   :  { %v271_v30 = vsel %vm265_vm9, %v262_v29, 1.0  ;;  %v223_v14 = vadd.f32 %v214_v28, %v583_v49 }
 0x136   :  { %276 = vxpose.xlu0.b32.cont [3/8] (short) (narrow) %v268_v10, 8  ;;  %v270_v43 = vsel %vm265_vm9, %v261_v21, 1.0  ;;  %v224_v37 = vadd.f32 %v216_v34, %v561_v36 }
 0x137   :  { %v263_v33 = vsub.f32 %v223_v14, %v253_v8 }
 0x139   :  { %v272_v32 = vsel %vm265_vm9, %v263_v33, 1.0 }
 0x13b   :  { %v256_v35 = vpop.xlane.xlu2 %255 }
 0x13c   :  { %v264_v39 = vsub.f32 %v224_v37, %v256_v35 }
 0x13e   :  { %277 = vxpose.xlu0.b32.cont [4/8] (short) (narrow) %v269_v17, 8  ;;  %v273_v40 = vsel %vm265_vm9, %v264_v39, 1.0 }
 0x146   :  { %278 = vxpose.xlu0.b32.cont [5/8] (short) (narrow) %v270_v43, 8 }
 0x14e   :  { %279 = vxpose.xlu0.b32.cont [6/8] (short) (narrow) %v271_v30, 8 }
 0x156   :  { %280 = vxpose.xlu0.b32.cont [7/8] (short) (narrow) %v272_v32, 8 }
 0x15e   :  { %281 = vxpose.xlu0.b32.end [8/8] (short) (narrow) %v273_v40, 8 }
 0x1ca   :  { %v290_v49 = vpop.trf.xlu0 }
 0x1cb   :  { %383 = vmatmul.msk.f32.vlgmr.msra.gmra.mxu0 %vm306_vm11, %v290_v49 }
 0x248   :  { %v327_v46 = vpop.f32.mrf.mxu0 }
 0x249   :  { %v331_v0 = vadd.f32 %v330_v42, %v327_v46 }
 0x24b   :  { %333 = vst.msk [vmem:[#allocation2] sm:$0x3] %vm60_vm10, %v331_v0 }
 0x252   :  { %v337_v36 = vld [vmem:[#allocation2] sm:$0x3] }
 0x253   :  { %338 = vst.msk [vmem:[#allocation3] sm:$0x3] %vm60_vm10, %v337_v36 }
 0x254   :  { %349 = dma.vmem_to_hbm [thread:$0]  %s345_s12, 32, %s347_s15, [#allocation4]  }
 0x255   :  { %447 = dma.done.wait [#allocation4], 32  }
 0x256   :  { %448 = vsyncadd [#allocation4], 4294967264 }
 0x257   :  { %354 = vsyncpa [#allocation4], 1 }

</bundles_post_ra>
